<compile_context>
chip_gen: v6e
topology: v6e:2x2x1
jax: 0.10.0
libtpu: 0.0.40
codegen_flags: <defaults>
</compile_context>

<pallas_src>
import functools

import jax
import jax.numpy as jnp
from jax.experimental import pallas as pl
from jax.experimental.pallas import tpu as pltpu


def _largest_divisor_leq(n, cap):
    cap = max(1, min(int(cap), int(n)))
    for d in range(cap, 0, -1):
        if n % d == 0:
            return d
    return 1


def _apply_act(acc, act):
    if act is None:
        return acc
    if act == "relu":
        return jnp.maximum(acc, 0.0)
    if act == "gelu":
        return jax.nn.gelu(acc)
    raise ValueError(f"unsupported act: {act}")


# ---------------------------------------------------------------------------
# Path 1: tiny channel counts (C_in, C_out <= 8) -> VPU scalar-broadcast FMAs.
# Layout (N, C, rows, 128): each per-channel slab is sublane/lane dense.
# ---------------------------------------------------------------------------
def _conv1x1_small_kernel(x_ref, w_ref, b_ref, o_ref, *, act):
    # x_ref: (bn, C_in, TR, 128)  VMEM
    # w_ref: (C_out, C_in)        SMEM (scalar reads)
    # b_ref: (C_out,)             SMEM (scalar reads)
    # o_ref: (bn, C_out, TR, 128) VMEM
    bn, c_in = x_ref.shape[0], x_ref.shape[1]
    c_out = o_ref.shape[1]
    for b in range(bn):
        for co in range(c_out):
            # init acc = bias + w*x (not zeros+add): one fewer VALU op / elem.
            acc = b_ref[co] + w_ref[co, 0] * x_ref[b, 0].astype(jnp.float32)
            for ci in range(1, c_in):
                acc = acc + w_ref[co, ci] * x_ref[b, ci].astype(jnp.float32)
            o_ref[b, co] = _apply_act(acc, act).astype(o_ref.dtype)


def _conv1x1_small(x, w_mat, b_vec, act, max_lane_tile, vmem_budget_bytes):
    N, C_in, H, W = x.shape
    C_out = w_mat.shape[0]
    M = H * W
    R = M // 128                       # 128-lane rows per channel per image
    itemsize = x.dtype.itemsize

    # Free relayout: NCHW is already (N, C, H*W) contiguous.
    x4 = x.reshape(N, C_in, R, 128)

    # Tile rows: as big as possible (amortize ~0.35us/step) while the
    # double-buffered in+out tiles fit the VMEM budget (v5e 16 MiB default).
    bytes_per_row = (C_in + C_out) * 128 * itemsize
    rows_budget = max(vmem_budget_bytes // (2 * bytes_per_row), 8)
    max_rows = min(max(max_lane_tile // 128, 8), rows_budget)

    if R <= max_rows:
        tr, grid_r = R, 1              # whole image per step (full-dim block)
        # Fold several images into one step for small feature maps, but keep
        # >= 2 grid steps when N >= 2 so both v7x TensorCores get work.
        bn_cap = min(max(max_rows // max(R, 1), 1), 8)
        if N >= 2:
            bn_cap = min(bn_cap, N // 2)
        bn = _largest_divisor_leq(N, bn_cap)
    else:
        tr = (max_rows // 8) * 8       # multiple of 8 -> (8,128)-legal block
        grid_r = pl.cdiv(R, tr)        # ragged last block is masked by Pallas
        bn = 1

    grid = (N // bn, grid_r)
    kernel = functools.partial(_conv1x1_small_kernel, act=act)

    out4 = pl.pallas_call(
        kernel,
        out_shape=jax.ShapeDtypeStruct((N, C_out, R, 128), x.dtype),
        grid_spec=pltpu.PrefetchScalarGridSpec(
            num_scalar_prefetch=0,
            grid=grid,
            in_specs=[
                pl.BlockSpec((bn, C_in, tr, 128), lambda n, r: (n, 0, r, 0)),
                pl.BlockSpec(memory_space=pltpu.MemorySpace.SMEM),
                pl.BlockSpec(memory_space=pltpu.MemorySpace.SMEM),
            ],
            out_specs=pl.BlockSpec((bn, C_out, tr, 128),
                                   lambda n, r: (n, 0, r, 0)),
        ),
        compiler_params=pltpu.CompilerParams(
            dimension_semantics=("parallel", "parallel"),
        ),
    )(x4, w_mat, b_vec)
    return out4.reshape(N, C_out, H, W)


# ---------------------------------------------------------------------------
# Path 2: real BDGnet channel counts (C >= 16) -> MXU contraction over C_in.
# Layout (N, C_in, M): channels on sublanes (dense for C_in >= 8), lanes = M.
# ---------------------------------------------------------------------------
def _conv1x1_mxu_kernel(x_ref, w_ref, b_ref, o_ref, *, act):
    # x_ref: (C_in, TM) VMEM; w_ref: (C_out, C_in) VMEM; b_ref: (C_out, 1) VMEM
    acc = jnp.dot(w_ref[...], x_ref[...].astype(jnp.float32),
                  preferred_element_type=jnp.float32)
    acc = acc + b_ref[...]
    o_ref[...] = _apply_act(acc, act).astype(o_ref.dtype)


def _conv1x1_mxu(x, w_mat, b_vec, act, max_lane_tile, vmem_budget_bytes):
    N, C_in, H, W = x.shape
    C_out = w_mat.shape[0]
    M = H * W
    itemsize = x.dtype.itemsize
    x3 = x.reshape(N, C_in, M)         # free: NCHW is already (N, C, H*W)
    b_col = b_vec.reshape(C_out, 1)

    bytes_per_lane = (C_in + C_out) * itemsize
    tm_budget = max(vmem_budget_bytes // (2 * bytes_per_lane), 128)
    tm_budget = min(tm_budget, max_lane_tile)
    if M <= tm_budget:
        tm, grid_m = M, 1              # full-dim block: no padding needed
    else:
        tm = (tm_budget // 128) * 128
        grid_m = pl.cdiv(M, tm)        # ragged last block is masked by Pallas

    grid = (N, grid_m)
    kernel = functools.partial(_conv1x1_mxu_kernel, act=act)

    out3 = pl.pallas_call(
        kernel,
        out_shape=jax.ShapeDtypeStruct((N, C_out, M), x.dtype),
        grid_spec=pltpu.PrefetchScalarGridSpec(
            num_scalar_prefetch=0,
            grid=grid,
            in_specs=[
                pl.BlockSpec((None, C_in, tm), lambda n, m: (n, 0, m)),
                pl.BlockSpec((C_out, C_in), lambda n, m: (0, 0)),
                pl.BlockSpec((C_out, 1), lambda n, m: (0, 0)),
            ],
            out_specs=pl.BlockSpec((None, C_out, tm), lambda n, m: (n, 0, m)),
        ),
        compiler_params=pltpu.CompilerParams(
            dimension_semantics=("parallel", "parallel"),
        ),
    )(x3, w_mat, b_col)
    return out3.reshape(N, C_out, H, W)


def conv1x1_nchw(x, weight, bias=None, *, act=None,
                 max_lane_tile=32768, vmem_budget_bytes=12 * 1024 * 1024):
    """1x1 conv: x (N,C_in,H,W), weight (C_out,C_in,1,1), bias (C_out,) or None.

    NCHW in / NCHW out, zero transposes, no wrapper pads. `act` in
    {None, 'relu', 'gelu'} is fused into the store epilogue (BatchNorm in
    inference mode can be folded into weight/bias by the caller).
    """
    N, C_in, H, W = x.shape
    C_out = weight.shape[0]
    M = H * W
    w_mat = weight.reshape(C_out, C_in).astype(jnp.float32)
    if bias is None:
        b_vec = jnp.zeros((C_out,), jnp.float32)
    else:
        b_vec = bias.astype(jnp.float32)

    if C_in <= 8 and C_out <= 8 and M % 128 == 0:
        return _conv1x1_small(x, w_mat, b_vec, act,
                              max_lane_tile, vmem_budget_bytes)
    # Larger channels (all dim=64 BDGnet 1x1 convs) and ragged-M small-channel
    # cases go through the pad-free MXU path.
    return _conv1x1_mxu(x, w_mat, b_vec, act, max_lane_tile, vmem_budget_bytes)


if __name__ == "__main__":
    key = jax.random.PRNGKey(0)
    k1, k2, k3, k4, k5, k6 = jax.random.split(key, 6)

    # Case 1: Boundary_Branch.conv style (dim -> 2 boundary channels) at the
    # full-resolution branch: tiny channels -> sublane-dense VPU path.
    N1, Ci1, H1, W1, Co1 = 2, 4, 32, 32, 2
    bnd1 = 1.0 / (Ci1 ** 0.5)          # nn.Conv2d default init bound
    x1 = jax.random.normal(k1, (N1, Ci1, H1, W1), jnp.float32)
    w1 = jax.random.uniform(k2, (Co1, Ci1, 1, 1), jnp.float32, -bnd1, bnd1)
    b1 = jax.random.uniform(k3, (Co1,), jnp.float32, -bnd1, bnd1)
    out1 = conv1x1_nchw(x1, w1, b1)

    # Case 2: detail_adj_channel style (4*dim -> dim, scaled down) at the 1/4
    # resolution branch: larger channels -> MXU path, fused ReLU epilogue.
    N2, Ci2, H2, W2, Co2 = 2, 32, 16, 16, 8
    bnd2 = 1.0 / (Ci2 ** 0.5)
    x2 = jax.random.normal(k4, (N2, Ci2, H2, W2), jnp.float32)
    w2 = jax.random.uniform(k5, (Co2, Ci2, 1, 1), jnp.float32, -bnd2, bnd2)
    b2 = jax.random.uniform(k6, (Co2,), jnp.float32, -bnd2, bnd2)
    out2 = conv1x1_nchw(x2, w2, b2, act="relu")

    jax.block_until_ready((out1, out2))

    # Plain-JAX references (same math as the PyTorch 1x1 convs).
    ref1 = jnp.einsum("nchw,oc->nohw", x1, w1.reshape(Co1, Ci1)) \
        + b1[None, :, None, None]
    ref2 = jnp.einsum("nchw,oc->nohw", x2, w2.reshape(Co2, Ci2)) \
        + b2[None, :, None, None]
    ref2 = jnp.maximum(ref2, 0.0)

    assert out1.shape == (N1, Co1, H1, W1)
    assert out2.shape == (N2, Co2, H2, W2)
    assert jnp.allclose(out1, ref1, atol=1e-4, rtol=1e-4)
    assert jnp.allclose(out2, ref2, atol=1e-4, rtol=1e-4)

    print("KERNEL_OK")
</pallas_src>

<mosaic_0001>
module attributes {stable_mosaic.version = 11 : i64} {
  func.func @_conv1x1_small_kernel(%arg0: i32, %arg1: i32, %arg2: memref<1x4x8x128xf32, #tpu.memory_space<vmem>>, %arg3: memref<2x4xf32, #tpu.memory_space<smem>>, %arg4: memref<2xf32, #tpu.memory_space<smem>>, %arg5: memref<1x2x8x128xf32, #tpu.memory_space<vmem>>) attributes {dimension_semantics = [#tpu.dimension_semantics<parallel>, #tpu.dimension_semantics<parallel>], iteration_bounds = array<i64: 2, 1>, scalar_prefetch = 0 : i64, scratch_operands = 0 : i64, tpu.core_type = #tpu.core_type<tc>, window_params = [{transform_indices = @transform_0, window_bounds = array<i64: 1, 4, 8, 128>}, {transform_indices = @transform_1, window_bounds = array<i64: 2, 4>}, {transform_indices = @transform_2, window_bounds = array<i64: 2>}, {transform_indices = @transform_3, window_bounds = array<i64: 1, 2, 8, 128>}]} {
    %c0 = arith.constant 0 : index
    %0 = memref.load %arg4[%c0] : memref<2xf32, #tpu.memory_space<smem>>
    %c0_0 = arith.constant 0 : index
    %c0_1 = arith.constant 0 : index
    %1 = memref.load %arg3[%c0_0, %c0_1] : memref<2x4xf32, #tpu.memory_space<smem>>
    %c0_2 = arith.constant 0 : index
    %c0_3 = arith.constant 0 : index
    %c0_4 = arith.constant 0 : index
    %c0_5 = arith.constant 0 : index
    %2 = vector.load %arg2[%c0_2, %c0_3, %c0_4, %c0_5] : memref<1x4x8x128xf32, #tpu.memory_space<vmem>>, vector<1x1x8x128xf32>
    %3 = vector.shape_cast %2 : vector<1x1x8x128xf32> to vector<8x128xf32>
    %4 = vector.broadcast %1 : f32 to vector<8x128xf32>
    %5 = arith.mulf %4, %3 : vector<8x128xf32>
    %6 = vector.broadcast %0 : f32 to vector<8x128xf32>
    %7 = arith.addf %6, %5 : vector<8x128xf32>
    %c0_6 = arith.constant 0 : index
    %c1 = arith.constant 1 : index
    %8 = memref.load %arg3[%c0_6, %c1] : memref<2x4xf32, #tpu.memory_space<smem>>
    %c0_7 = arith.constant 0 : index
    %c1_8 = arith.constant 1 : index
    %c0_9 = arith.constant 0 : index
    %c0_10 = arith.constant 0 : index
    %9 = vector.load %arg2[%c0_7, %c1_8, %c0_9, %c0_10] : memref<1x4x8x128xf32, #tpu.memory_space<vmem>>, vector<1x1x8x128xf32>
    %10 = vector.shape_cast %9 : vector<1x1x8x128xf32> to vector<8x128xf32>
    %11 = vector.broadcast %8 : f32 to vector<8x128xf32>
    %12 = arith.mulf %11, %10 : vector<8x128xf32>
    %13 = arith.addf %7, %12 : vector<8x128xf32>
    %c0_11 = arith.constant 0 : index
    %c2 = arith.constant 2 : index
    %14 = memref.load %arg3[%c0_11, %c2] : memref<2x4xf32, #tpu.memory_space<smem>>
    %c0_12 = arith.constant 0 : index
    %c2_13 = arith.constant 2 : index
    %c0_14 = arith.constant 0 : index
    %c0_15 = arith.constant 0 : index
    %15 = vector.load %arg2[%c0_12, %c2_13, %c0_14, %c0_15] : memref<1x4x8x128xf32, #tpu.memory_space<vmem>>, vector<1x1x8x128xf32>
    %16 = vector.shape_cast %15 : vector<1x1x8x128xf32> to vector<8x128xf32>
    %17 = vector.broadcast %14 : f32 to vector<8x128xf32>
    %18 = arith.mulf %17, %16 : vector<8x128xf32>
    %19 = arith.addf %13, %18 : vector<8x128xf32>
    %c0_16 = arith.constant 0 : index
    %c3 = arith.constant 3 : index
    %20 = memref.load %arg3[%c0_16, %c3] : memref<2x4xf32, #tpu.memory_space<smem>>
    %c0_17 = arith.constant 0 : index
    %c3_18 = arith.constant 3 : index
    %c0_19 = arith.constant 0 : index
    %c0_20 = arith.constant 0 : index
    %21 = vector.load %arg2[%c0_17, %c3_18, %c0_19, %c0_20] : memref<1x4x8x128xf32, #tpu.memory_space<vmem>>, vector<1x1x8x128xf32>
    %22 = vector.shape_cast %21 : vector<1x1x8x128xf32> to vector<8x128xf32>
    %23 = vector.broadcast %20 : f32 to vector<8x128xf32>
    %24 = arith.mulf %23, %22 : vector<8x128xf32>
    %25 = arith.addf %19, %24 : vector<8x128xf32>
    %c0_21 = arith.constant 0 : index
    %c0_22 = arith.constant 0 : index
    %c0_23 = arith.constant 0 : index
    %c0_24 = arith.constant 0 : index
    %26 = vector.load %arg5[%c0_21, %c0_22, %c0_23, %c0_24] : memref<1x2x8x128xf32, #tpu.memory_space<vmem>>, vector<1x1x8x128xf32>
    %27 = vector.shape_cast %26 : vector<1x1x8x128xf32> to vector<8x128xf32>
    %28 = vector.shape_cast %25 : vector<8x128xf32> to vector<1x1x8x128xf32>
    tpu.vector_store %arg5[%c0_21, %c0_22, %c0_23, %c0_24], %28 {strides = array<i32>} : memref<1x2x8x128xf32, #tpu.memory_space<vmem>>, vector<1x1x8x128xf32>,
    %c1_25 = arith.constant 1 : index
    %29 = memref.load %arg4[%c1_25] : memref<2xf32, #tpu.memory_space<smem>>
    %c1_26 = arith.constant 1 : index
    %c0_27 = arith.constant 0 : index
    %30 = memref.load %arg3[%c1_26, %c0_27] : memref<2x4xf32, #tpu.memory_space<smem>>
    %c0_28 = arith.constant 0 : index
    %c0_29 = arith.constant 0 : index
    %c0_30 = arith.constant 0 : index
    %c0_31 = arith.constant 0 : index
    %31 = vector.load %arg2[%c0_28, %c0_29, %c0_30, %c0_31] : memref<1x4x8x128xf32, #tpu.memory_space<vmem>>, vector<1x1x8x128xf32>
    %32 = vector.shape_cast %31 : vector<1x1x8x128xf32> to vector<8x128xf32>
    %33 = vector.broadcast %30 : f32 to vector<8x128xf32>
    %34 = arith.mulf %33, %32 : vector<8x128xf32>
    %35 = vector.broadcast %29 : f32 to vector<8x128xf32>
    %36 = arith.addf %35, %34 : vector<8x128xf32>
    %c1_32 = arith.constant 1 : index
    %c1_33 = arith.constant 1 : index
    %37 = memref.load %arg3[%c1_32, %c1_33] : memref<2x4xf32, #tpu.memory_space<smem>>
    %c0_34 = arith.constant 0 : index
    %c1_35 = arith.constant 1 : index
    %c0_36 = arith.constant 0 : index
    %c0_37 = arith.constant 0 : index
    %38 = vector.load %arg2[%c0_34, %c1_35, %c0_36, %c0_37] : memref<1x4x8x128xf32, #tpu.memory_space<vmem>>, vector<1x1x8x128xf32>
    %39 = vector.shape_cast %38 : vector<1x1x8x128xf32> to vector<8x128xf32>
    %40 = vector.broadcast %37 : f32 to vector<8x128xf32>
    %41 = arith.mulf %40, %39 : vector<8x128xf32>
    %42 = arith.addf %36, %41 : vector<8x128xf32>
    %c1_38 = arith.constant 1 : index
    %c2_39 = arith.constant 2 : index
    %43 = memref.load %arg3[%c1_38, %c2_39] : memref<2x4xf32, #tpu.memory_space<smem>>
    %c0_40 = arith.constant 0 : index
    %c2_41 = arith.constant 2 : index
    %c0_42 = arith.constant 0 : index
    %c0_43 = arith.constant 0 : index
    %44 = vector.load %arg2[%c0_40, %c2_41, %c0_42, %c0_43] : memref<1x4x8x128xf32, #tpu.memory_space<vmem>>, vector<1x1x8x128xf32>
    %45 = vector.shape_cast %44 : vector<1x1x8x128xf32> to vector<8x128xf32>
    %46 = vector.broadcast %43 : f32 to vector<8x128xf32>
    %47 = arith.mulf %46, %45 : vector<8x128xf32>
    %48 = arith.addf %42, %47 : vector<8x128xf32>
    %c1_44 = arith.constant 1 : index
    %c3_45 = arith.constant 3 : index
    %49 = memref.load %arg3[%c1_44, %c3_45] : memref<2x4xf32, #tpu.memory_space<smem>>
    %c0_46 = arith.constant 0 : index
    %c3_47 = arith.constant 3 : index
    %c0_48 = arith.constant 0 : index
    %c0_49 = arith.constant 0 : index
    %50 = vector.load %arg2[%c0_46, %c3_47, %c0_48, %c0_49] : memref<1x4x8x128xf32, #tpu.memory_space<vmem>>, vector<1x1x8x128xf32>
    %51 = vector.shape_cast %50 : vector<1x1x8x128xf32> to vector<8x128xf32>
    %52 = vector.broadcast %49 : f32 to vector<8x128xf32>
    %53 = arith.mulf %52, %51 : vector<8x128xf32>
    %54 = arith.addf %48, %53 : vector<8x128xf32>
    %c0_50 = arith.constant 0 : index
    %c1_51 = arith.constant 1 : index
    %c0_52 = arith.constant 0 : index
    %c0_53 = arith.constant 0 : index
    %55 = vector.load %arg5[%c0_50, %c1_51, %c0_52, %c0_53] : memref<1x2x8x128xf32, #tpu.memory_space<vmem>>, vector<1x1x8x128xf32>
    %56 = vector.shape_cast %55 : vector<1x1x8x128xf32> to vector<8x128xf32>
    %57 = vector.shape_cast %54 : vector<8x128xf32> to vector<1x1x8x128xf32>
    tpu.vector_store %arg5[%c0_50, %c1_51, %c0_52, %c0_53], %57 {strides = array<i32>} : memref<1x2x8x128xf32, #tpu.memory_space<vmem>>, vector<1x1x8x128xf32>,
    return
  }
  func.func @transform_0(%arg0: i32, %arg1: i32) -> (i32, i32, i32, i32) {
    %c0_i32 = arith.constant 0 : i32
    %c0_i32_0 = arith.constant 0 : i32
    %c0_i32_1 = arith.constant 0 : i32
    return %arg0, %c0_i32, %arg1, %c0_i32_0 : i32, i32, i32, i32
  }
  func.func @transform_1(%arg0: i32, %arg1: i32) -> (i32, i32) {
    %c0_i32 = arith.constant 0 : i32
    %c0_i32_0 = arith.constant 0 : i32
    %c0_i32_1 = arith.constant 0 : i32
    return %c0_i32, %c0_i32_0 : i32, i32
  }
  func.func @transform_2(%arg0: i32, %arg1: i32) -> i32 {
    %c0_i32 = arith.constant 0 : i32
    %c0_i32_0 = arith.constant 0 : i32
    return %c0_i32 : i32
  }
  func.func @transform_3(%arg0: i32, %arg1: i32) -> (i32, i32, i32, i32) {
    %c0_i32 = arith.constant 0 : i32
    %c0_i32_0 = arith.constant 0 : i32
    %c0_i32_1 = arith.constant 0 : i32
    return %arg0, %c0_i32, %arg1, %c0_i32_0 : i32, i32, i32, i32
  }
}

</mosaic_0001>

<bundles_post_ra>
// kernel: tpu_custom_call.1
= control target key start
LH: loop header
LB: loop body
LE: loop exit
PB: predicated region body
PF: predicated region fallthrough
CT: control target
= control target key end

     0   :  { %s881_s0 = inlined_call_operand.hbm [shape: f32[2,4,8,128], index: 0, kind: input, shape index: {}]   ;;  %s882_s1 = inlined_call_operand.hbm [shape: f32[2,4], index: 1, kind: input, shape index: {}]   ;;  %s883_s2 = inlined_call_operand.vmem [shape: f32[2], index: 2, kind: input, shape index: {}]   ;;  %s884_s3 = inlined_call_operand.hbm [shape: f32[2,2,8,128], index: 3, kind: output, shape index: {}]  }
   0x1   :  { %886 = sst [smem:[#allocation14_spill]] %s882_s1 }
   0x2   :  { %8 = vsyncpa [#allocation3], 0 }
   0x3   :  { %10 = vsyncpa [#allocation3 + $0x1], 0 }
   0x4   :  { %11 = vsyncpa [#allocation5], 0 }
   0x5   :  { %12 = vsyncpa [#allocation6], 0 }
   0x6   :  { %13 = vsyncpa [#allocation4], 0 }
   0x7   :  { %15 = vsyncpa [#allocation4 + $0x1], 0  ;;  %s700_s12 = smov 0   ;;  %s702_s13 = smov 0  }
   0x8   :  { %s704_s14 = smov 0   ;;  %s706_s15 = smov 0  }
   0x9   :  { %s708_s16 = smov 0   ;;  %s710_s17 = smov 0  }
   0xa LB: > { %s405_s18 = sadd.s32 4294967295, %s670_s17   ;;  %s406_s19 = sadd.s32 4294967294, %s670_s17   ;;  %s670_s17 = sphi %s710_s17, %s21_s17   ;;  %s666_s16 = sphi %s708_s16, %s902_s16   ;;  %s662_s15 = sphi %s706_s15, %s901_s15   ;;  %s658_s14 = sphi %s704_s14, %s900_s14   ;;  %s654_s13 = sphi %s702_s13, %s899_s13   ;;  %s650_s12 = sphi %s700_s12, %s898_s12  }
   0xb   : > { %s42_s20 = sadd.s32 1, %s658_s14  ;;  %p49_p0 = scmp.ne.s32.totalorder %s658_s14, %s654_s13 }
   0xc   : > { %p50_p1 = scmp.eq.s32.totalorder %s670_s17, 0  ;;  %p55_p2 = scmp.ne.s32.totalorder %s654_s13, %s650_s12 }
   0xd   : > { %p738_p3 = scmp.eq.s32.totalorder %s405_s18, 0  ;;  %p123_p4 = scmp.eq.s32.totalorder %s405_s18, 1 }
   0xe   : > { %p51_p5 = por %p50_p1, %p49_p0  ;;  %p129_p6 = scmp.eq.s32.totalorder %s406_s19, 1 }
   0xf   : > { %p744_p7 = por %p738_p3, %p55_p2  ;;  %p748_p8 = por %p123_p4, %p49_p0 }
  0x10   : > { %p752_p9 = por %p129_p6, %p55_p2  ;;  %p407_p10 = scmp.ge.s32.totalorder %s670_s17, 1 }
  0x11   : > { %s889_s23 = scalar_select %p748_p8, 1, 0 }
  0x12   : > { %s890_s24 = scalar_select %p752_p9, 1, 0 }
  0x13   : > { %p136_p11 = scmp.lt.s32.totalorder %s670_s17, 3  ;;  %p470_p1 = scmp.lt.s32.totalorder %s670_s17, 2 }
  0x14   : > { %s158_s28 = sshll.u32 %s883_s2, 4  ;;  %s169_s4 = sand.u32 1, %s658_s14   ;;  %s159_s28 = int_to_ptr.vmem [resolvable:$true] %s158_s28 }
  0x15   : > { %p759_p13 = pnand %p407_p10, %p136_p11  ;;  %p769_p4 = pnand %p470_p1, %p51_p5 }
  0x16   : > { %s33_s5 = sadd.s32 1, %s666_s16  ;;  %s672_s6 = smov [#allocation7]  }
  0x17   : > { %p453_p0 = pneg %p759_p13  ;;  %s894_s1 = sld [smem:[#allocation14_spill]] }
  0x18   : > { %s539_s9 = scalar_lea.vmem %s159_s28, 16  ;;  %p547_p1 = scmp.lt.s32.totalorder %s159_s28, %s159_s28 }
  0x19   : > { %p775_p2 = pnand %p453_p0, %p738_p3  ;;  %p540_p5 = scmp.ne.s32.totalorder %s159_s28, %s539_s9 }
  0x1a   : > { %p548_p0 = scmp.lt.s32.totalorder %s539_s9, %s539_s9 }
  0x1b   : > { %p541_p6 = pneg %p775_p2 }
  0x1c   : > { %p549_p12 = por %p548_p0, %p547_p1 }
  0x1d   : > { %456 = dma.hbm_to_smem (!%p775_p2), %s894_s1, 32, %s672_s6, [#allocation5]  }
  0x1e   : > { %p542_p10 = pnand %p541_p6, %p540_p5 }
  0x20   : > { %p543_p11 = pneg %p542_p10 }
  0x22   : > { %p550_p9 = pnand %p549_p12, %p543_p11 }
  0x24   : > { %553 = shalt.err (!%p550_p9)
}
  0x25   : > { %s673_s10 = smov [#allocation8]   ;;  %p35_p8 = scmp.ge.s32.totalorder %s33_s5, 2 }
  0x26   : > { %459 = dma.vmem_to_smem (!%p775_p2), %s159_s28, 16, %s673_s10, [#allocation6]  }
  0x27   : > { %s411_s11 = sshll.u32 %s169_s4, 5  ;;  %s439_s18 = sshll.u32 %s666_s16, 9 }
  0x28   : > { %s904_s5 = smov (%p35_p8, %s33_s5), 0  ;;  %s180_s27 = scalar_lea.hbm %s881_s0, %s439_s18 }
  0x29   : > { %s37_s6 = ssub.s32 %s666_s16, %s904_s5  ;;  %s173_s7 = scalar_lea.vmem [#allocation2], %s411_s11 }
  0x2a   : > { %s181_s8 = sshll.u32 %s173_s7, 4  ;;  %p40_p9 = scmp.eq.s32.totalorder %s37_s6, 0  ;;  %s182_s8 = int_to_ptr.vmem [resolvable:$true] %s181_s8 }
  0x2b   : > { %s170_s9 = scalar_lea.sflag [#allocation3], %s169_s4  ;;  %p556_p12 = pneg %p769_p4 }
  0x2c   : > { %s801_s30 = scalar_select %p40_p9, %s658_s14, %s42_s20  }
  0x2d   : > { %s567_s28 = scalar_lea.vmem %s182_s8, 512  ;;  %s674_s10 = smov [#allocation2]  }
  0x2e   : > { %p568_p2 = scmp.ne.s32.totalorder %s182_s8, %s567_s28  ;;  %s572_s1 = sshll.u32 %s674_s10, 4  ;;  %s573_s1 = int_to_ptr.vmem [resolvable:$false] %s572_s1 }
  0x2f   : > { %s574_s19 = scalar_lea.vmem %s573_s1, 1024  ;;  %p575_p6 = scmp.lt.s32.totalorder %s182_s8, %s573_s1 }
  0x30   : > { %p570_p8 = pnand %p568_p2, %p556_p12  ;;  %p576_p10 = scmp.lt.s32.totalorder %s574_s19, %s567_s28 }
  0x32   : > { %p571_p5 = pneg %p570_p8  ;;  %p577_p11 = por %p576_p10, %p575_p6 }
  0x34   : > { %p578_p1 = pnand %p577_p11, %p571_p5 }
  0x36   : > { %581 = shalt.err (!%p578_p1)
}
  0x37   : > { %s675_s11 = smov 128   ;;  %s676_s20 = smov 8  }
  0x38   : > { %463 = dma.hbm_to_vmem [thread:$0]  (!%p769_p4), %s180_s27, 512, %s182_s8, %s170_s9, %s675_s11, %s675_s11, %s676_s20  }
  0x39   : > { %193 = sbr.rel (%p759_p13) target bundleno = 106 (0x6a), region = 32  ;;  %s810_s4 = sand.u32 (!%p759_p13), 1, %s654_s13  }
  0x3a   : > { %s415_s18 = sshll.u32 (!%p759_p13), %s810_s4, 5  ;;  %s196_s1 = scalar_lea.sflag (!%p759_p13), [#allocation3], %s810_s4 }
  0x3b   : > { %s199_s26 = scalar_lea.vmem (!%p759_p13), [#allocation2], %s415_s18 }
  0x3e   : > { %633 = dma.done.wait (%p744_p7), %s196_s1, 512  }
  0x3f   : > { %635 = vsyncadd (%p744_p7), %s196_s1, 4294966784 }
  0x40   : > { %637 = dma.done.wait (%p738_p3), [#allocation5], 32  }
  0x41   : > { %639 = vsyncadd (%p738_p3), [#allocation5], 4294967264 }
  0x42   : > { %641 = dma.done.wait (%p738_p3), [#allocation6], 16  }
  0x43   : > { %643 = vsyncadd (%p738_p3), [#allocation6], 4294967280 }
  0x44   : > { %212 = sfence }
  0x45   : > { %s231_s25 = sld [smem:[#allocation8]]  ;;  %v233_v0 = vld [vmem:[%s199_s26] sm:$0xff]  ;;  %v420_v1 = vld [vmem:[%s199_s26 + $0x8] sm:$0xff]  ;;  %v422_v4 = vld [vmem:[%s199_s26 + $0x10] sm:$0xff]  ;;  %s418_s10 = sshll.u32 %s810_s4, 4 }
  0x46   : > { %s232_s29 = sld [smem:[#allocation7]]  ;;  %v424_v9 = vld [vmem:[%s199_s26 + $0x18] sm:$0xff]  ;;  %s230_s19 = scalar_lea.vmem [#allocation9], %s418_s10 }
  0x47   : > { %s419_s27 = sld [smem:[#allocation7 + $0x1]]  ;;  %s296_s11 = sshll.u32 %s230_s19, 4  ;;  %s828_s11 = int_to_ptr.vmem [resolvable:$true] %s296_s11 }
  0x48   : > { %s421_s6 = sld [smem:[#allocation7 + $0x2]]  ;;  %s440_s20 = sshll.u32 %s662_s15, 8 }
  0x49   : > { %s423_s7 = sld [smem:[#allocation7 + $0x3]]  ;;  %s833_s26 = scalar_lea.hbm %s884_s3, %s440_s20 }
  0x4a   : > { %s425_s22 = sld [smem:[#allocation8 + $0x1]]  ;;  %p895_p7 = scmp.ne.s32.totalorder %s889_s23, 0 }
  0x4b   : > { %s426_s8 = sld [smem:[#allocation7 + $0x80]]  ;;  %v236_v3 = vstv %s231_s25  ;;  %s282_s25 = scalar_lea.sflag [#allocation4], %s810_s4 }
  0x4c   : > { %v234_v2 = vstv %s232_s29  ;;  %s427_s9 = sld [smem:[#allocation7 + $0x81]]  ;;  %s582_s29 = scalar_lea.vmem %s828_s11, 256 }
  0x4d   : > { %v235_v5 = vmul.f32 %v234_v2, %v233_v0  ;;  %v241_v6 = vstv %s419_s27  ;;  %s429_s28 = sld [smem:[#allocation7 + $0x82]]  ;;  %p583_p3 = scmp.ne.s32.totalorder %s828_s11, %s582_s29 }
  0x4e   : > { %v242_v7 = vmul.f32 %v420_v1, %v241_v6  ;;  %v247_v8 = vstv %s421_s6  ;;  %s431_s21 = sld [smem:[#allocation7 + $0x83]]  ;;  %s677_s15 = smov [#allocation9]  }
  0x4f   : > { %v237_v10 = vadd.f32 %v236_v3, %v235_v5  ;;  %v248_v11 = vmul.f32 %v422_v4, %v247_v8  ;;  %v253_v12 = vstv %s423_s7  ;;  %p584_p13 = pnand %p583_p3, %p895_p7  ;;  %s586_s27 = sshll.u32 %s677_s15, 4  ;;  %s587_s27 = int_to_ptr.vmem [resolvable:$false] %s586_s27 }
  0x50   : > { %v254_v14 = vmul.f32 %v424_v9, %v253_v12  ;;  %v262_v16 = vstv %s425_s22  ;;  %s588_s6 = scalar_lea.vmem %s587_s27, 512  ;;  %p589_p0 = scmp.lt.s32.totalorder %s828_s11, %s587_s27 }
  0x51   : > { %v243_v13 = vadd.f32 %v242_v7, %v237_v10  ;;  %v260_v15 = vstv %s426_s8  ;;  %p585_p4 = pneg %p584_p13  ;;  %p590_p9 = scmp.lt.s32.totalorder %s588_s6, %s582_s29 }
  0x52   : > { %v261_v17 = vmul.f32 %v260_v15, %v233_v0  ;;  %v266_v18 = vstv %s427_s9 }
  0x53   : > { %v249_v19 = vadd.f32 %v248_v11, %v243_v13  ;;  %v267_v20 = vmul.f32 %v420_v1, %v266_v18  ;;  %v271_v21 = vstv %s429_s28  ;;  %p591_p12 = por %p590_p9, %p589_p0 }
  0x54   : > { %v263_v22 = vadd.f32 %v262_v16, %v261_v17  ;;  %v272_v23 = vmul.f32 %v422_v4, %v271_v21  ;;  %v276_v24 = vstv %s431_s21 }
  0x55   : > { %v255_v25 = vadd.f32 %v254_v14, %v249_v19  ;;  %v277_v27 = vmul.f32 %v424_v9, %v276_v24  ;;  %p592_p2 = pnand %p591_p12, %p585_p4 }
  0x56   : > { %v268_v26 = vadd.f32 %v267_v20, %v263_v22 }
  0x57   : > { %256 = vst [vmem:[%s230_s19] sm:$0xff] %v255_v25 }
  0x58   : > { %v273_v28 = vadd.f32 %v272_v23, %v268_v26 }
  0x5a   : > { %v278_v29 = vadd.f32 %v277_v27, %v273_v28 }
  0x5c   : > { %433 = vst [vmem:[%s230_s19 + $0x8] sm:$0xff] %v278_v29 }
  0x5d   : > { %595 = shalt.err (!%p592_p2)
}
  0x5e   : > { %s596_s7 = scalar_lea.hbm %s833_s26, 256  ;;  %s600_s9 = scalar_lea.hbm %s884_s3, 512 }
  0x5f   : > { %p597_p8 = scmp.ne.s32.totalorder %s833_s26, %s596_s7  ;;  %p601_p10 = scmp.lt.s32.totalorder %s833_s26, %s884_s3 }
  0x60   : > { %p602_p11 = scmp.lt.s32.totalorder %s600_s9, %s596_s7 }
  0x61   : > { %p598_p5 = pnand %p597_p8, %p895_p7 }
  0x62   : > { %p603_p1 = por %p602_p11, %p601_p10 }
  0x63   : > { %p599_p6 = pneg %p598_p5 }
  0x65   : > { %p604_p3 = pnand %p603_p1, %p599_p6 }
  0x67   : > { %607 = shalt.err (!%p604_p3)
}
  0x68   : > { %s678_s10 = smov 128   ;;  %s679_s19 = smov 8  }
  0x69   : > { %451 = dma.vmem_to_hbm [thread:$0]  (%p895_p7), %s828_s11, 256, %s833_s26, %s282_s25, %s678_s10, %s678_s10, %s679_s19  }
  0x6a PF: > { %s311_s20 = sand.u32 1, %s650_s12   ;;  %p896_p13 = scmp.ne.s32.totalorder %s890_s24, 0 }
  0x6b   : > { %p897_p4 = scmp.ge.s32.totalorder %s670_s17, 2  ;;  %s312_s18 = scalar_lea.sflag [#allocation4], %s311_s20 }
  0x6d   : > { %p465_p0 = pnand %p897_p4, %p896_p13 }
  0x6f   : > { %p466_p9 = pneg %p465_p0 }
  0x71   : > { %645 = dma.done.wait (%p466_p9), %s312_s18, 256  }
  0x72   : > { %647 = vsyncadd (%p466_p9), %s312_s18, 4294967040  ;;  %s21_s17 = sadd.s32 1, %s670_s17   ;;  %s898_s12 = smov %s654_s13 }
  0x73   : > { %p18_p12 = scmp.ge.s32.totalorder %s21_s17, 4   ;;  %s899_s13 = smov %s658_s14 }
  0x74   : > { %s900_s14 = smov %s801_s30  ;;  %s901_s15 = smov %s666_s16 }
  0x75   : > { %s902_s16 = smov %s904_s5  ;;  %20 = sbr.rel (!%p18_p12) target bundleno = 10 (0xa), region = 91 }
  0x7a   :  { %317 = vsyncpa [#allocation3], 1 }
  0x7b   :  { %319 = vsyncpa [#allocation3 + $0x1], 1 }
  0x7c   :  { %320 = vsyncpa [#allocation4], 1 }
  0x7d   :  { %322 = vsyncpa [#allocation4 + $0x1], 1 }
  0x7e   :  { %323 = vsyncpa [#allocation5], 1 }
  0x7f   :  { %325 = vsyncpa [#allocation5 + $0x1], 1 }
  0x80   :  { %326 = vsyncpa [#allocation6], 1 }
  0x81   :  { %328 = vsyncpa [#allocation6 + $0x1], 1 }

</bundles_post_ra>
